<compile_context>
chip_gen: v5e
topology: v5e:2x2
jax: 0.10.0
libtpu: 0.0.40
codegen_flags: <defaults>
</compile_context>

<pallas_src>
import jax
import jax.numpy as jnp
from jax.experimental import pallas as pl
from jax.experimental.pallas import tpu as pltpu

IN_FEATS = 8
H0, H1 = 32, 64            # hidden_dims = [32, 64]
OUT_FEATS = 128
NUM_PEERS = 8
LANES = 128
N_ROWS = 16                # peers (8) + agent (1) padded up to a sublane multiple

# Packed-parameter row offsets. Every segment starts on a multiple of 8 rows so all
# in-kernel ref slices are sublane-aligned.
OFF_W1 = 0                 # (8, 128)   [aw1.T | pw1.T | 0]
OFF_B1 = 8                 # row 8      [ab1 | pb1 | 0]
OFF_CWT = 16               # row 16     context-weight column for `time`
OFF_CB = 24                # row 24     context bias
OFF_M1 = 32                # (16,128)   per-row layer-1 branch mask
OFF_IND = 48               # (16,128)   per-row bias-indicator lanes (64 = agent, 65 = peer)
OFF_W2 = 64                # (128,128)  block-diag [aw2.T ; pw2.T] + bias rows at 64/65
OFF_CW = 192               # (256,128)  folded / full context-weight blocks
PACK_ROWS = OFF_CW + 2 * LANES   # 448


def context_encoder_kernel(agent_ref, peers_ref, time_ref, params_ref, out_ref):
    n_peers = peers_ref.shape[0]
    in_feats = peers_ref.shape[1]

    t = time_ref[0, 0]                                   # SMEM scalar

    # ---- static, sublane-aligned views of the packed parameter array --------------
    W1 = params_ref[OFF_W1:OFF_W1 + in_feats, :]         # (8, 128)
    b1 = params_ref[OFF_B1:OFF_B1 + 1, :]                # (1, 128)
    cwt = params_ref[OFF_CWT:OFF_CWT + 1, :]             # (1, 128)
    cb = params_ref[OFF_CB:OFF_CB + 1, :]                # (1, 128)
    M1 = params_ref[OFF_M1:OFF_M1 + N_ROWS, :]           # (16, 128)
    IND = params_ref[OFF_IND:OFF_IND + N_ROWS, :]        # (16, 128)
    W2 = params_ref[OFF_W2:OFF_W2 + LANES, :]            # (128, 128)
    CW = params_ref[OFF_CW:OFF_CW + 2 * LANES, :]        # (256, 128)

    # ---- fused trunk: peers rows 0..P-1, agent row P, zero pad rows ----------------
    x = jnp.concatenate(
        [peers_ref[...], agent_ref[...],
         jnp.zeros((N_ROWS - n_peers - 1, in_feats), jnp.float32)], axis=0)   # (16, 8)

    h1 = jnp.maximum(jnp.dot(x, W1, preferred_element_type=jnp.float32) + b1, 0.0)
    # h1: cols 0:32 = agent-branch layer-1 (valid on agent row only),
    #     cols 32:64 = peer-branch layer-1 (valid on peer rows only), cols 64:128 = 0.
    # Select the valid half per row and plant the layer-2 bias indicator lanes (64/65).
    h1m = h1 * M1 + IND                                                        # (16, 128)
    # Layer-2 bias is carried by W2 rows 64/65 (driven by IND), so no +b2 and no 2nd mask.
    h2 = jnp.maximum(jnp.dot(h1m, W2, preferred_element_type=jnp.float32), 0.0)  # (16,128)

    # ---- row reduction on the MXU (idle slot) instead of an XLU sublane reduce -----
    hm = jnp.concatenate([h1m, h2], axis=1)                                    # (16, 256)
    ones = jnp.ones((1, N_ROWS), jnp.float32)
    s = jnp.dot(ones, hm, preferred_element_type=jnp.float32)                  # (1, 256)
    # s lanes: [ag_x | sum(peer_x) | indicator counts (hit zero CW rows) | ag_x_1 | sum(peer_x_1)]

    # ---- context linear with the repeat(1,2) folded into pre-added weight blocks ---
    ctx = jnp.dot(s, CW, preferred_element_type=jnp.float32) + t * cwt + cb    # (1, 128)
    out_ref[...] = jnp.maximum(ctx, 0.0)


def init_params(key):
    """PyTorch-layout (out, in) parameters — used by the pure-JAX reference."""
    ks = jax.random.split(key, 10)

    def lin(kw, kb, out_f, in_f):
        bound = 1.0 / jnp.sqrt(in_f)
        w = jax.random.uniform(kw, (out_f, in_f), jnp.float32, -bound, bound)
        b = jax.random.uniform(kb, (out_f,), jnp.float32, -bound, bound)
        return w, b

    aw1, ab1 = lin(ks[0], ks[1], H0, IN_FEATS)
    aw2, ab2 = lin(ks[2], ks[3], H1, H0)
    pw1, pb1 = lin(ks[4], ks[5], H0, IN_FEATS)
    pw2, pb2 = lin(ks[6], ks[7], H1, H0)
    cw, cb = lin(ks[8], ks[9], OUT_FEATS, H1 * 2 + 1)
    return dict(aw1=aw1, ab1=ab1, aw2=aw2, ab2=ab2,
                pw1=pw1, pb1=pb1, pw2=pw2, pb2=pb2, cw=cw, cb=cb)


def prepare_params(p):
    """One-time packing of all parameters (plus masks/indicators) into one (448,128) array."""
    W1 = jnp.zeros((IN_FEATS, LANES), jnp.float32)
    W1 = W1.at[:, 0:H0].set(p["aw1"].T).at[:, H0:2 * H0].set(p["pw1"].T)

    b1 = jnp.zeros((LANES,), jnp.float32)
    b1 = b1.at[0:H0].set(p["ab1"]).at[H0:2 * H0].set(p["pb1"])

    # Per-row layer-1 branch mask (agent row keeps cols 0:32, peer rows keep cols 32:64).
    M1 = jnp.zeros((N_ROWS, LANES), jnp.float32)
    M1 = M1.at[0:NUM_PEERS, H0:H1].set(1.0)
    M1 = M1.at[NUM_PEERS, 0:H0].set(1.0)

    # Bias-indicator lanes: lane 64 = 1 on the agent row, lane 65 = 1 on peer rows.
    IND = jnp.zeros((N_ROWS, LANES), jnp.float32)
    IND = IND.at[NUM_PEERS, H1].set(1.0)
    IND = IND.at[0:NUM_PEERS, H1 + 1].set(1.0)

    # Block-diagonal layer-2 weight with biases folded into indicator-driven rows.
    W2 = jnp.zeros((LANES, LANES), jnp.float32)
    W2 = W2.at[0:H0, 0:H1].set(p["aw2"].T).at[H0:2 * H0, H1:2 * H1].set(p["pw2"].T)
    W2 = W2.at[H1, 0:H1].set(p["ab2"])
    W2 = W2.at[H1 + 1, H1:2 * H1].set(p["pb2"])

    cw_t = p["cw"].T                                      # (129, 128)
    cw_time = cw_t[0]                                     # (128,)
    cw_ag = cw_t[1:1 + H1]                                # (64, 128)
    cw_pe = cw_t[1 + H1:]                                 # (64, 128)

    CW = jnp.zeros((2 * LANES, LANES), jnp.float32)
    CW = CW.at[0:H0].set(cw_ag[0:H0] + cw_ag[H0:H1])      # folded agent repeat(1,2)
    CW = CW.at[H0:H1].set(cw_pe[0:H0] + cw_pe[H0:H1])     # folded peer repeat(1,2)
    CW = CW.at[LANES:LANES + H1].set(cw_ag)
    CW = CW.at[LANES + H1:].set(cw_pe)

    def row_block(v):  # (128,) -> (8, 128) with v in row 0 (keeps segments 8-aligned)
        return jnp.zeros((8, LANES), jnp.float32).at[0].set(v)

    packed = jnp.concatenate(
        [W1, row_block(b1), row_block(cw_time), row_block(p["cb"]), M1, IND, W2, CW],
        axis=0)
    assert packed.shape == (PACK_ROWS, LANES)
    return packed


@jax.jit
def context_encoder(agent, peers, time, packed_params):
    vmem = pl.BlockSpec(memory_space=pltpu.MemorySpace.VMEM)
    smem = pl.BlockSpec(memory_space=pltpu.MemorySpace.SMEM)
    return pl.pallas_call(
        context_encoder_kernel,
        out_shape=jax.ShapeDtypeStruct((1, OUT_FEATS), jnp.float32),
        in_specs=[vmem, vmem, smem, vmem],
        out_specs=vmem,
    )(agent, peers, time, packed_params)


def reference(agent, peers, time, p):
    relu = lambda x: jnp.maximum(x, 0.0)
    ag_x = relu(agent @ p["aw1"].T + p["ab1"])
    ag_x_1 = relu(ag_x @ p["aw2"].T + p["ab2"])
    ag_x_2 = jnp.tile(ag_x, (1, H1 // H0)) + ag_x_1
    peer_x = relu(peers @ p["pw1"].T + p["pb1"])
    peer_x_1 = relu(peer_x @ p["pw2"].T + p["pb2"])
    peer_x_2 = jnp.tile(peer_x, (1, H1 // H0)) + peer_x_1
    peer_x_2 = jnp.sum(peer_x_2, axis=0, keepdims=True)
    x = relu(jnp.concatenate((time, ag_x_2, peer_x_2), axis=1) @ p["cw"].T + p["cb"])
    return x


if __name__ == "__main__":
    key = jax.random.PRNGKey(0)
    k_p, k_a, k_pe, k_t = jax.random.split(key, 4)
    params = init_params(k_p)
    packed = jax.block_until_ready(prepare_params(params))   # one-time weight packing

    agent = jax.random.normal(k_a, (1, IN_FEATS), jnp.float32)
    peers = jax.random.normal(k_pe, (NUM_PEERS, IN_FEATS), jnp.float32)
    time = jax.random.uniform(k_t, (1, 1), jnp.float32)

    out = jax.block_until_ready(context_encoder(agent, peers, time, packed))

    ref = reference(agent, peers, time, params)
    assert out.shape == (1, OUT_FEATS)
    assert jnp.allclose(out, ref, atol=1e-4, rtol=1e-4)
    # TODO(synk): for throughput workloads, add a batch grid axis (many samples per
    # pallas_call, "parallel" semantics to use both v7x TensorCores); at batch=1 this
    # kernel is intentionally latency-minimal (1 weight DMA + 4 MXU pushes).
    print("KERNEL_OK")
</pallas_src>

<mosaic_0001>
module attributes {stable_mosaic.version = 11 : i64} {
  func.func @context_encoder_kernel(%arg0: memref<1x8xf32, #tpu.memory_space<vmem>>, %arg1: memref<8x8xf32, #tpu.memory_space<vmem>>, %arg2: memref<1x1xf32, #tpu.memory_space<smem>>, %arg3: memref<448x128xf32, #tpu.memory_space<vmem>>, %arg4: memref<1x128xf32, #tpu.memory_space<vmem>>) attributes {dimension_semantics = [], scalar_prefetch = 0 : i64, scratch_operands = 0 : i64, tpu.core_type = #tpu.core_type<tc>} {
    %c0 = arith.constant 0 : index
    %c0_0 = arith.constant 0 : index
    %0 = memref.load %arg2[%c0, %c0_0] : memref<1x1xf32, #tpu.memory_space<smem>>
    %c0_1 = arith.constant 0 : index
    %c0_2 = arith.constant 0 : index
    %1 = vector.load %arg3[%c0_1, %c0_2] : memref<448x128xf32, #tpu.memory_space<vmem>>, vector<8x128xf32>
    %c8 = arith.constant 8 : index
    %c0_3 = arith.constant 0 : index
    %2 = vector.load %arg3[%c8, %c0_3] : memref<448x128xf32, #tpu.memory_space<vmem>>, vector<1x128xf32>
    %c16 = arith.constant 16 : index
    %c0_4 = arith.constant 0 : index
    %3 = vector.load %arg3[%c16, %c0_4] : memref<448x128xf32, #tpu.memory_space<vmem>>, vector<1x128xf32>
    %c24 = arith.constant 24 : index
    %c0_5 = arith.constant 0 : index
    %4 = vector.load %arg3[%c24, %c0_5] : memref<448x128xf32, #tpu.memory_space<vmem>>, vector<1x128xf32>
    %c32 = arith.constant 32 : index
    %c0_6 = arith.constant 0 : index
    %5 = vector.load %arg3[%c32, %c0_6] : memref<448x128xf32, #tpu.memory_space<vmem>>, vector<16x128xf32>
    %c48 = arith.constant 48 : index
    %c0_7 = arith.constant 0 : index
    %6 = vector.load %arg3[%c48, %c0_7] : memref<448x128xf32, #tpu.memory_space<vmem>>, vector<16x128xf32>
    %c64 = arith.constant 64 : index
    %c0_8 = arith.constant 0 : index
    %7 = vector.load %arg3[%c64, %c0_8] : memref<448x128xf32, #tpu.memory_space<vmem>>, vector<128x128xf32>
    %c192 = arith.constant 192 : index
    %c0_9 = arith.constant 0 : index
    %8 = vector.load %arg3[%c192, %c0_9] : memref<448x128xf32, #tpu.memory_space<vmem>>, vector<256x128xf32>
    %c0_10 = arith.constant 0 : index
    %c0_11 = arith.constant 0 : index
    %9 = vector.load %arg1[%c0_10, %c0_11] : memref<8x8xf32, #tpu.memory_space<vmem>>, vector<8x8xf32>
    %c0_12 = arith.constant 0 : index
    %c0_13 = arith.constant 0 : index
    %10 = vector.load %arg0[%c0_12, %c0_13] : memref<1x8xf32, #tpu.memory_space<vmem>>, vector<1x8xf32>
    %cst = arith.constant 0.000000e+00 : f32
    %11 = vector.broadcast %cst : f32 to vector<7x8xf32>
    %12 = tpu.concatenate %9, %10, %11 in 0 : vector<8x8xf32>, vector<1x8xf32>, vector<7x8xf32> -> vector<16x8xf32>
    %cst_14 = arith.constant dense<0.000000e+00> : vector<16x128xf32>
    %13 = tpu.matmul %12, %1, %cst_14 {dimension_numbers = #tpu.dot_dimension_numbers<[1], [0], [0], [1], [0, 0, 1, 1], [], []>} : vector<16x8xf32>, vector<8x128xf32>, vector<16x128xf32> -> vector<16x128xf32>
    %14 = vector.broadcast %2 : vector<1x128xf32> to vector<16x128xf32>
    %15 = arith.addf %13, %14 : vector<16x128xf32>
    %cst_15 = arith.constant 0.000000e+00 : f32
    %16 = vector.broadcast %cst_15 : f32 to vector<16x128xf32>
    %17 = arith.maximumf %15, %16 : vector<16x128xf32>
    %18 = arith.mulf %17, %5 : vector<16x128xf32>
    %19 = arith.addf %18, %6 : vector<16x128xf32>
    %cst_16 = arith.constant dense<0.000000e+00> : vector<16x128xf32>
    %20 = tpu.matmul %19, %7, %cst_16 {dimension_numbers = #tpu.dot_dimension_numbers<[1], [0], [0], [1], [0, 0, 1, 1], [], []>} : vector<16x128xf32>, vector<128x128xf32>, vector<16x128xf32> -> vector<16x128xf32>
    %cst_17 = arith.constant 0.000000e+00 : f32
    %21 = vector.broadcast %cst_17 : f32 to vector<16x128xf32>
    %22 = arith.maximumf %20, %21 : vector<16x128xf32>
    %23 = tpu.concatenate %19, %22 in 1 : vector<16x128xf32>, vector<16x128xf32> -> vector<16x256xf32>
    %cst_18 = arith.constant 1.000000e+00 : f32
    %24 = vector.broadcast %cst_18 : f32 to vector<1x16xf32>
    %cst_19 = arith.constant dense<0.000000e+00> : vector<1x256xf32>
    %25 = tpu.matmul %24, %23, %cst_19 {dimension_numbers = #tpu.dot_dimension_numbers<[1], [0], [0], [1], [0, 0, 1, 1], [], []>} : vector<1x16xf32>, vector<16x256xf32>, vector<1x256xf32> -> vector<1x256xf32>
    %cst_20 = arith.constant dense<0.000000e+00> : vector<1x128xf32>
    %26 = tpu.matmul %25, %8, %cst_20 {dimension_numbers = #tpu.dot_dimension_numbers<[1], [0], [0], [1], [0, 0, 1, 1], [], []>} : vector<1x256xf32>, vector<256x128xf32>, vector<1x128xf32> -> vector<1x128xf32>
    %27 = vector.broadcast %0 : f32 to vector<1x128xf32>
    %28 = arith.mulf %27, %3 : vector<1x128xf32>
    %29 = arith.addf %26, %28 : vector<1x128xf32>
    %30 = arith.addf %29, %4 : vector<1x128xf32>
    %cst_21 = arith.constant 0.000000e+00 : f32
    %31 = vector.broadcast %cst_21 : f32 to vector<1x128xf32>
    %32 = arith.maximumf %30, %31 : vector<1x128xf32>
    %c0_22 = arith.constant 0 : index
    %c0_23 = arith.constant 0 : index
    %33 = vector.load %arg4[%c0_22, %c0_23] : memref<1x128xf32, #tpu.memory_space<vmem>>, vector<1x128xf32>
    tpu.vector_store %arg4[%c0_22, %c0_23], %32 {strides = array<i32>} : memref<1x128xf32, #tpu.memory_space<vmem>>, vector<1x128xf32>,
    return
  }
}

</mosaic_0001>

<bundles_post_ra>
// kernel: context_encoder.1
= control target key start
LH: loop header
LB: loop body
LE: loop exit
PB: predicated region body
PF: predicated region fallthrough
CT: control target
= control target key end

     0   :  { %10 = vsyncpa [#allocation4], 0  ;;  %s420_s0 = inlined_call_operand.vmem [shape: f32[1,8], index: 0, kind: input, shape index: {}]   ;;  %s421_s1 = inlined_call_operand.hbm [shape: f32[8,8], index: 1, kind: input, shape index: {}]   ;;  %s422_s2 = inlined_call_operand.<no memory space> [shape: f32[1,1], index: 2, kind: input, shape index: {}]   ;;  %s423_s3 = inlined_call_operand.hbm [shape: f32[448,128], index: 3, kind: input, shape index: {}]   ;;  %s424_s4 = inlined_call_operand.hbm [shape: f32[1,128], index: 4, kind: output, shape index: {}]  }
   0x1   :  { %11 = vsyncpa [#allocation7], 0 }
   0x2   :  { %12 = vsyncpa [#allocation5], 0  ;;  %s20_s17 = sshll.u32 %s421_s1, 4  ;;  %s368_s18 = smov [#allocation3]   ;;  %s21_s17 = int_to_ptr.hbm [resolvable:$true] %s20_s17 }
   0x3   :  { %s22_s19 = sshll.u32 %s368_s18, 4  ;;  %s32_s22 = sshll.u32 %s423_s3, 4  ;;  %s23_s19 = int_to_ptr.vmem [resolvable:$true] %s22_s19  ;;  %s33_s22 = int_to_ptr.hbm [resolvable:$true] %s32_s22 }
   0x4   :  { %25 = dma.hbm_to_vmem [thread:$0]  %s21_s17, 128, %s23_s19, [#allocation4]  }
   0x5   :  { %s369_s23 = smov [#allocation6]   ;;  %s370_s25 = smov 128  }
   0x6   :  { %s34_s24 = sshll.u32 %s369_s23, 4  ;;  %s371_s26 = smov 8   ;;  %s35_s24 = int_to_ptr.vmem [resolvable:$true] %s34_s24 }
   0x7   :  { %40 = dma.hbm_to_vmem [thread:$0]  %s33_s22, 7168, %s35_s24, [#allocation7], %s370_s25, %s370_s25, %s371_s26  }
   0x8   :  { %362 = dma.done.wait [#allocation4], 128  }
   0x9   :  { %363 = vsyncadd [#allocation4], 4294967168 }
   0xa   :  { %364 = dma.done.wait [#allocation7], 7168  }
   0xb   :  { %365 = vsyncadd [#allocation7], 4294960128  ;;  %vm111_vm0 = vcmask 64512   ;;  %v50_v0 = vld [vmem:[#allocation6] sm:$0xff]  ;;  %v106_v1 = vld [vmem:[#allocation3] sm:$0xff]  ;;  %vm108_vm1 = vcmask 1040384  }
   0xc   :  { %133 = vmatpush.msra.mxu0 %v50_v0  ;;  %v73_v2 = vld [vmem:[#allocation6 + $0xb8] sm:$0xff]  ;;  %v72_v3 = vld [vmem:[#allocation6 + $0xb0] sm:$0xff]  ;;  %v71_v4 = vld [vmem:[#allocation6 + $0xa8] sm:$0xff]  ;;  %vm172_vm2 = vcmask 130048   ;;  %v372_v35 = vmov 1.0   ;;  %s373_s28 = smov [#allocation8]  }
   0xd   :  { %279 = vmatmul.msk.f32.vlgmr.msra.gmra.mxu0 %vm111_vm0, %v106_v1  ;;  %147 = vmatpush.msra.mxu1 %v73_v2  ;;  %v107_v5 = vld [vmem:[%s420_s0] sm:$0x1]  ;;  %v70_v6 = vld [vmem:[#allocation6 + $0xa0] sm:$0xff]  ;;  %v68_v9 = vld [vmem:[#allocation6 + $0x90] sm:$0xff]  ;;  %s266_s29 = sshll.u32 %s373_s28, 4  ;;  %s268_s6 = sshll.u32 %s424_s4, 4  ;;  %s267_s29 = int_to_ptr.vmem [resolvable:$true] %s266_s29  ;;  %s269_s6 = int_to_ptr.hbm [resolvable:$true] %s268_s6 }
   0xe   :  { %v109_v7 = vsel %vm108_vm1, %v107_v5, 0.0  ;;  %v69_v8 = vld [vmem:[#allocation6 + $0x98] sm:$0xff]  ;;  %v67_v10 = vld [vmem:[#allocation6 + $0x88] sm:$0xff]  ;;  %v66_v11 = vld [vmem:[#allocation6 + $0x80] sm:$0xff] }
   0xf   :  { %148 = vmatpush.msra.mxu1 %v72_v3  ;;  %v65_v12 = vld [vmem:[#allocation6 + $0x78] sm:$0xff]  ;;  %v64_v13 = vld [vmem:[#allocation6 + $0x70] sm:$0xff]  ;;  %v63_v14 = vld [vmem:[#allocation6 + $0x68] sm:$0xff] }
  0x10   :  { %v62_v15 = vld [vmem:[#allocation6 + $0x60] sm:$0xff]  ;;  %v61_v16 = vld [vmem:[#allocation6 + $0x58] sm:$0xff]  ;;  %v60_v17 = vld [vmem:[#allocation6 + $0x50] sm:$0xff] }
  0x11   :  { %149 = vmatpush.msra.mxu1 %v71_v4  ;;  %v59_v18 = vld [vmem:[#allocation6 + $0x48] sm:$0xff]  ;;  %v58_v19 = vld [vmem:[#allocation6 + $0x40] sm:$0xff]  ;;  %v56_v25 = vld [vmem:[#allocation6 + $0x30] sm:$0xff] }
  0x12   :  { %v289_v20 = vld [vmem:[#allocation6 + $0x8] ss:$0 sm:$0xff]  ;;  %v54_v23 = vld [vmem:[#allocation6 + $0x20] sm:$0xff]  ;;  %v57_v32 = vld [vmem:[#allocation6 + $0x38] sm:$0xff] }
  0x13   :  { %150 = vmatpush.msra.mxu1 %v70_v6  ;;  %v55_v30 = vld [vmem:[#allocation6 + $0x28] sm:$0xff]  ;;  %v105_v36 = vld [vmem:[#allocation6 + $0x1b8] sm:$0xff]  ;;  %v104_v37 = vld [vmem:[#allocation6 + $0x1b0] sm:$0xff] }
  0x14   :  { %v89_v38 = vld [vmem:[#allocation6 + $0x138] sm:$0xff]  ;;  %v88_v39 = vld [vmem:[#allocation6 + $0x130] sm:$0xff]  ;;  %v103_v40 = vld [vmem:[#allocation6 + $0x1a8] sm:$0xff] }
  0x15   :  { %280 = vmatmul.msk.f32.gmra.mxu0 %vm111_vm0, %v109_v7  ;;  %151 = vmatpush.msra.mxu1 %v69_v8  ;;  %v87_v41 = vld [vmem:[#allocation6 + $0x128] sm:$0xff]  ;;  %v102_v42 = vld [vmem:[#allocation6 + $0x1a0] sm:$0xff]  ;;  %v101_v44 = vld [vmem:[#allocation6 + $0x198] sm:$0xff] }
  0x16   :  { %218 = vmatpush.msrb.mxu0 %v89_v38  ;;  %v86_v43 = vld [vmem:[#allocation6 + $0x120] sm:$0xff]  ;;  %v85_v45 = vld [vmem:[#allocation6 + $0x118] sm:$0xff]  ;;  %v100_v46 = vld [vmem:[#allocation6 + $0x190] sm:$0xff] }
  0x17   :  { %152 = vmatpush.msra.mxu1 %v68_v9  ;;  %v84_v47 = vld [vmem:[#allocation6 + $0x110] sm:$0xff]  ;;  %v99_v48 = vld [vmem:[#allocation6 + $0x188] sm:$0xff]  ;;  %v98_v50 = vld [vmem:[#allocation6 + $0x180] sm:$0xff] }
  0x18   :  { %219 = vmatpush.msrb.mxu0 %v88_v39  ;;  %v83_v49 = vld [vmem:[#allocation6 + $0x108] sm:$0xff]  ;;  %v82_v51 = vld [vmem:[#allocation6 + $0x100] sm:$0xff]  ;;  %v97_v52 = vld [vmem:[#allocation6 + $0x178] sm:$0xff] }
  0x19   :  { %153 = vmatpush.msra.mxu1 %v67_v10  ;;  %v81_v53 = vld [vmem:[#allocation6 + $0xf8] sm:$0xff]  ;;  %v96_v54 = vld [vmem:[#allocation6 + $0x170] sm:$0xff]  ;;  %v95_v57 = vld [vmem:[#allocation6 + $0x168] sm:$0xff] }
  0x1a   :  { %220 = vmatpush.msrb.mxu0 %v87_v41  ;;  %v80_v55 = vld [vmem:[#allocation6 + $0xf0] sm:$0xff]  ;;  %v79_v58 = vld [vmem:[#allocation6 + $0xe8] sm:$0xff]  ;;  %v94_v59 = vld [vmem:[#allocation6 + $0x160] sm:$0xff] }
  0x1b   :  { %154 = vmatpush.msra.mxu1 %v66_v11  ;;  %v78_v60 = vld [vmem:[#allocation6 + $0xe0] sm:$0xff]  ;;  %v93_v61 = vld [vmem:[#allocation6 + $0x158] sm:$0xff]  ;;  %v92_v63 = vld [vmem:[#allocation6 + $0x150] sm:$0xff]  ;;  %v216_v11 = vstv %s422_s2 }
  0x1c   :  { %221 = vmatpush.msrb.mxu0 %v86_v43  ;;  %v77_v62 = vld [vmem:[#allocation6 + $0xd8] sm:$0xff]  ;;  %v91_v1 = vld [vmem:[#allocation6 + $0x148] sm:$0xff]  ;;  %v76_v4 = vld [vmem:[#allocation6 + $0xd0] sm:$0xff] }
  0x1d   :  { %155 = vmatpush.msra.mxu1 %v65_v12  ;;  %v90_v5 = vld [vmem:[#allocation6 + $0x140] sm:$0xff]  ;;  %v75_v6 = vld [vmem:[#allocation6 + $0xc8] sm:$0xff]  ;;  %v52_v10 = vld [vmem:[#allocation6 + $0x10] sm:$0x1] }
  0x1e   :  { %222 = vmatpush.msrb.mxu0 %v85_v45  ;;  %v74_v7 = vld [vmem:[#allocation6 + $0xc0] sm:$0xff]  ;;  %v217_v12 = vmul.f32 %v216_v11, %v52_v10 }
  0x1f   :  { %156 = vmatpush.msra.mxu1 %v64_v13 }
  0x20   :  { %223 = vmatpush.msrb.mxu0 %v84_v47 }
  0x21   :  { %157 = vmatpush.msra.mxu1 %v63_v14 }
  0x22   :  { %224 = vmatpush.msrb.mxu0 %v83_v49 }
  0x23   :  { %158 = vmatpush.msra.mxu1 %v62_v15  ;;  %v53_v15 = vld [vmem:[#allocation6 + $0x18] sm:$0x1] }
  0x24   :  { %225 = vmatpush.msrb.mxu0 %v82_v51 }
  0x25   :  { %159 = vmatpush.msra.mxu1 %v61_v16 }
  0x26   :  { %226 = vmatpush.msrb.mxu0 %v81_v53 }
  0x27   :  { %160 = vmatpush.msra.mxu1 %v60_v17 }
  0x28   :  { %227 = vmatpush.msrb.mxu0 %v80_v55 }
  0x29   :  { %161 = vmatpush.msra.mxu1 %v59_v18 }
  0x2a   :  { %228 = vmatpush.msrb.mxu0 %v79_v58 }
  0x2b   :  { %162 = vmatpush.msra.mxu1 %v58_v19 }
  0x2c   :  { %229 = vmatpush.msrb.mxu0 %v78_v60 }
  0x2e   :  { %230 = vmatpush.msrb.mxu0 %v77_v62 }
  0x30   :  { %231 = vmatpush.msrb.mxu0 %v76_v4 }
  0x32   :  { %232 = vmatpush.msrb.mxu0 %v75_v6 }
  0x34   :  { %233 = vmatpush.msrb.mxu0 %v74_v7 }
  0x8a   :  { %v135_v21 = vpop.f32.mrf.mxu0 }
  0x8b   :  { %v136_v22 = vadd.f32 %v289_v20, %v135_v21 }
  0x8d   :  { %v141_v24 = vmax.f32 %v136_v22, 0.0 }
  0x8f   :  { %v143_v26 = vmul.f32 %v141_v24, %v54_v23 }
  0x91   :  { %v145_v27 = vadd.f32 %v143_v26, %v56_v25 }
  0x92   :  { %v138_v28 = vpop.f32.mrf.mxu0 }
  0x93   :  { %v139_v29 = vadd.f32 %v289_v20, %v138_v28  ;;  %163 = vmatmul.f32.vlgmr.msra.gmra.mxu1 %v145_v27 }
  0x95   :  { %v142_v31 = vmax.f32 %v139_v29, 0.0 }
  0x97   :  { %v144_v33 = vmul.f32 %v142_v31, %v55_v30 }
  0x99   :  { %v146_v34 = vadd.f32 %v144_v33, %v57_v32 }
  0x9b   :  { %166 = vmatmul.f32.gmra.mxu1 %v146_v34  ;;  %190 = vmatpush.msra.mxu2 %v146_v34 }
  0x9d   :  { %191 = vmatpush.msra.mxu2 %v145_v27 }
  0x9e   :  { %281 = vmatmul.msk.f32.vlgmr.msra.gmra.mxu2 %vm172_vm2, %v372_v35 }
  0x9f   :  { %238 = vmatpush.msrb.mxu2 %v105_v36 }
  0xa1   :  { %239 = vmatpush.msrb.mxu2 %v104_v37 }
  0xa3   :  { %240 = vmatpush.msrb.mxu2 %v103_v40 }
  0xa5   :  { %241 = vmatpush.msrb.mxu2 %v102_v42 }
  0xa7   :  { %242 = vmatpush.msrb.mxu2 %v101_v44 }
  0xa9   :  { %243 = vmatpush.msrb.mxu2 %v100_v46 }
  0xab   :  { %244 = vmatpush.msrb.mxu2 %v99_v48 }
  0xad   :  { %245 = vmatpush.msrb.mxu2 %v98_v50 }
  0xaf   :  { %246 = vmatpush.msrb.mxu2 %v97_v52 }
  0xb1   :  { %247 = vmatpush.msrb.mxu2 %v96_v54 }
  0xb3   :  { %248 = vmatpush.msrb.mxu2 %v95_v57 }
  0xb5   :  { %249 = vmatpush.msrb.mxu2 %v94_v59 }
  0xb7   :  { %250 = vmatpush.msrb.mxu2 %v93_v61 }
  0xb9   :  { %251 = vmatpush.msrb.mxu2 %v92_v63 }
  0xbb   :  { %252 = vmatpush.msrb.mxu2 %v91_v1 }
  0xbd   :  { %253 = vmatpush.msrb.mxu2 %v90_v5 }
 0x110   :  { %v164_v56 = vpop.f32.mrf.mxu1 }
 0x111   :  { %v170_v3 = vmax.f32 %v164_v56, 0.0 }
 0x118   :  { %v167_v0 = vpop.f32.mrf.mxu1 }
 0x119   :  { %v171_v2 = vmax.f32 %v167_v0, 0.0 }
 0x11b   :  { %210 = vmatpush.msra.mxu3 %v171_v2 }
 0x11d   :  { %211 = vmatpush.msra.mxu3 %v170_v3 }
 0x11e   :  { %282 = vmatmul.msk.f32.vlgmr.msra.gmra.mxu3 %vm172_vm2, %v372_v35 }
 0x121   :  { %v193_v8 = vpop.f32.mrf.mxu2 }
 0x122   :  { %234 = vmatmul.f32.vlgmr.msrb.gmra.mxu0 %v193_v8 }
 0x19f   :  { %v235_v13 = vpop.f32.mrf.mxu0 }
 0x1a0   :  { %v236_v14 = vadd.f32 %v235_v13, %v217_v12 }
 0x1a1   :  { %v213_v9 = vpop.f32.mrf.mxu3 }
 0x1a2   :  { %254 = vmatmul.f32.vlgmr.msrb.gmra.mxu2 %v213_v9 }
 0x225   :  { %v255_v16 = vpop.f32.mrf.mxu2 }
 0x226   :  { %v256_v17 = vadd.f32 %v255_v16, %v236_v14 }
 0x228   :  { %v258_v18 = vadd.f32 %v256_v17, %v53_v15 }
 0x22a   :  { %v259_v19 = vmax.f32 %v258_v18, 0.0 }
 0x22c   :  { %260 = vst [vmem:[#allocation8] sm:$0x1] %v259_v19 }
 0x22d   :  { %271 = dma.vmem_to_hbm [thread:$0]  %s267_s29, 16, %s269_s6, [#allocation5]  }
 0x22e   :  { %366 = dma.done.wait [#allocation5], 16  }
 0x22f   :  { %367 = vsyncadd [#allocation5], 4294967280 }
 0x230   :  { %276 = vsyncpa [#allocation4], 1 }
 0x231   :  { %277 = vsyncpa [#allocation7], 1 }
 0x232   :  { %278 = vsyncpa [#allocation5], 1 }

</bundles_post_ra>
